<compile_context>
chip_gen: v6e
topology: v6e:2x2x1
jax: 0.10.0
libtpu: 0.0.40
codegen_flags: <defaults>
</compile_context>

<pallas_src>
import functools

import numpy as np
import jax
import jax.numpy as jnp
from jax.experimental import pallas as pl
from jax.experimental.pallas import tpu as pltpu

NBASIS = 9
_EPS = 1e-12                    # matches F.normalize default eps
_LANES = 128
_SUBLANES = 8
_CHUNK = _SUBLANES * _LANES     # 1024 points = one fully dense f32 vreg


def _sgbasis_kernel(lobe_ref, v_ref, n_ref, l_ref, a_ref, w_ref,
                    brdf_ref, spec_ref, *, nbasis):
    # Refs (planar / SoA, points on the lane axis):
    #   lobe_ref : SMEM (nbasis,)        pre-clamped lobe scalars
    #   v/n/l/a  : VMEM (3, TR, 128)
    #   w_ref    : VMEM (nbasis, TR, 128)
    #   brdf_ref : VMEM (3, TR, 128)
    #   spec_ref : VMEM (1, TR, 128)
    hx = l_ref[0] + v_ref[0]
    hy = l_ref[1] + v_ref[1]
    hz = l_ref[2] + v_ref[2]

    # F.normalize: h / max(||h||, eps)  ==  h * rsqrt(max(||h||^2, eps^2))
    norm_sq = hx * hx + hy * hy + hz * hz
    inv_norm = jax.lax.rsqrt(jnp.maximum(norm_sq, _EPS * _EPS))    # EUP slot

    # cos(h, n) - 1, with the 1/||h|| factored out of the dot product.
    cos_m1 = (hx * n_ref[0] + hy * n_ref[1] + hz * n_ref[2]) * inv_norm - 1.0

    # specular = clamp(sum_j w_j * exp(lobe_j * cos_m1), 0)
    # Unrolled over the (small, static) basis count; exps go to the EUP slot,
    # the fused mul/adds to the VALU, so the two streams overlap.
    spec = w_ref[0] * jnp.exp(lobe_ref[0] * cos_m1)
    for j in range(1, nbasis):
        spec = spec + w_ref[j] * jnp.exp(lobe_ref[j] * cos_m1)
    spec = jnp.maximum(spec, 0.0)

    spec_ref[0] = spec
    brdf_ref[0] = a_ref[0] + spec
    brdf_ref[1] = a_ref[1] + spec
    brdf_ref[2] = a_ref[2] + spec


def sgbasis_forward(v, n, l, albedo, weights, lobe, *, tile_points=32768):
    """SGBasis forward (specular_rgb=False).

    v, n, l, albedo : [N, 3]; weights : [N, nbasis]; lobe : [nbasis]
    Returns (brdf [N, 3], specular [N, 1]) in float32.
    """
    N = v.shape[0]
    nbasis = weights.shape[-1]

    # Hoisted out of the kernel: clamp the (fixed) lobe parameter once.
    lobe_c = jnp.maximum(lobe.astype(jnp.float32).reshape(nbasis), 0.0)

    # Tile sizing: multiples of 1024 points (8 sublanes x 128 lanes).
    # 32K points  =>  25 f32 planes * 32768 * 4 B ≈ 3.3 MiB per step,
    # ≈ 6.6 MiB double-buffered: fits default scoped VMEM on v5e/v6e/v7x.
    tile_points = max(_CHUNK, min(tile_points, pl.cdiv(N, _CHUNK) * _CHUNK))
    tile_points = (tile_points // _CHUNK) * _CHUNK
    n_pad = pl.cdiv(N, tile_points) * tile_points
    rows = n_pad // _LANES
    tile_r = tile_points // _LANES
    grid = (rows // tile_r,)

    def to_planar(x, c):
        # [N, c] -> [c, rows, 128]: points on the 128-lane axis, zero padded.
        # Padded points yield h=0 -> cos_m1=-1 -> finite D, and weights=0 ->
        # specular=0, so no NaN/Inf leaks even though they're sliced away.
        xt = jnp.transpose(x.astype(jnp.float32), (1, 0))
        xt = jnp.pad(xt, ((0, 0), (0, n_pad - N)))
        return xt.reshape(c, rows, _LANES)

    v_p = to_planar(v, 3)
    n_p = to_planar(n, 3)
    l_p = to_planar(l, 3)
    a_p = to_planar(albedo, 3)
    w_p = to_planar(weights, nbasis)

    vec_spec = pl.BlockSpec((3, tile_r, _LANES), lambda i, s: (0, i, 0))
    w_spec = pl.BlockSpec((nbasis, tile_r, _LANES), lambda i, s: (0, i, 0))

    brdf_p, spec_p = pl.pallas_call(
        functools.partial(_sgbasis_kernel, nbasis=nbasis),
        out_shape=(
            jax.ShapeDtypeStruct((3, rows, _LANES), jnp.float32),   # brdf
            jax.ShapeDtypeStruct((1, rows, _LANES), jnp.float32),   # specular
        ),
        grid_spec=pltpu.PrefetchScalarGridSpec(
            num_scalar_prefetch=1,          # lobe -> SMEM
            grid=grid,
            in_specs=[vec_spec, vec_spec, vec_spec, vec_spec, w_spec],
            out_specs=(
                pl.BlockSpec((3, tile_r, _LANES), lambda i, s: (0, i, 0)),
                pl.BlockSpec((1, tile_r, _LANES), lambda i, s: (0, i, 0)),
            ),
        ),
        compiler_params=pltpu.CompilerParams(
            dimension_semantics=("parallel",)),   # shards across v7x's 2 TCs
    )(lobe_c, v_p, n_p, l_p, a_p, w_p)

    # Back to the module's output layout: [N, 3] and [N, 1].
    brdf = jnp.transpose(brdf_p.reshape(3, n_pad), (1, 0))[:N]
    spec = spec_p.reshape(n_pad)[:N, None]
    return brdf, spec


def _reference(v, n, l, albedo, weights, lobe):
    h = l + v
    h = h / jnp.maximum(jnp.linalg.norm(h, axis=-1, keepdims=True), _EPS)
    D = jnp.exp(jnp.maximum(lobe[None, :], 0.0) *
                (jnp.sum(h * n, axis=-1, keepdims=True) - 1.0))
    spec = jnp.clip(jnp.sum(weights * D, axis=-1, keepdims=True), 0.0)
    return albedo + spec, spec


if __name__ == "__main__":
    key = jax.random.PRNGKey(0)
    N = 1000   # small demo size; not a multiple of the tile -> exercises padding

    k1, k2, k3, k4, k5 = jax.random.split(key, 5)
    v = jax.random.normal(k1, (N, 3), dtype=jnp.float32)
    n = jax.random.normal(k2, (N, 3), dtype=jnp.float32)
    n = n / jnp.linalg.norm(n, axis=-1, keepdims=True)
    l = jax.random.normal(k3, (N, 3), dtype=jnp.float32)
    albedo = jax.random.uniform(k4, (N, 3), dtype=jnp.float32)
    weights = jax.random.normal(k5, (N, NBASIS), dtype=jnp.float32) * 0.1

    # Deterministic parameter init, exactly as in the module's __init__:
    lobe = jnp.asarray([np.exp(i) for i in range(2, 11)], dtype=jnp.float32)

    brdf, spec = sgbasis_forward(v, n, l, albedo, weights, lobe)
    jax.block_until_ready((brdf, spec))

    brdf_ref, spec_ref = _reference(v, n, l, albedo, weights, lobe)
    # exp(lobe * ...) with lobe up to e^10 amplifies ulp-level differences
    # between rsqrt and sqrt+divide; use a correspondingly relaxed tolerance.
    np.testing.assert_allclose(np.asarray(brdf), np.asarray(brdf_ref),
                               rtol=1e-4, atol=1e-4)
    np.testing.assert_allclose(np.asarray(spec), np.asarray(spec_ref),
                               rtol=1e-4, atol=1e-4)

    print("KERNEL_OK")
</pallas_src>

<mosaic_0001>
module attributes {stable_mosaic.version = 11 : i64} {
  func.func @_sgbasis_kernel(%arg0: i32, %arg1: memref<9xf32, #tpu.memory_space<smem>>, %arg2: memref<3x8x128xf32, #tpu.memory_space<vmem>>, %arg3: memref<3x8x128xf32, #tpu.memory_space<vmem>>, %arg4: memref<3x8x128xf32, #tpu.memory_space<vmem>>, %arg5: memref<3x8x128xf32, #tpu.memory_space<vmem>>, %arg6: memref<9x8x128xf32, #tpu.memory_space<vmem>>, %arg7: memref<3x8x128xf32, #tpu.memory_space<vmem>>, %arg8: memref<1x8x128xf32, #tpu.memory_space<vmem>>) attributes {dimension_semantics = [#tpu.dimension_semantics<parallel>], iteration_bounds = array<i64: 1>, scalar_prefetch = 1 : i64, scratch_operands = 0 : i64, tpu.core_type = #tpu.core_type<tc>, window_params = [{transform_indices = @transform_0, window_bounds = array<i64: 3, 8, 128>}, {transform_indices = @transform_1, window_bounds = array<i64: 3, 8, 128>}, {transform_indices = @transform_2, window_bounds = array<i64: 3, 8, 128>}, {transform_indices = @transform_3, window_bounds = array<i64: 3, 8, 128>}, {transform_indices = @transform_4, window_bounds = array<i64: 9, 8, 128>}, {transform_indices = @transform_5, window_bounds = array<i64: 3, 8, 128>}, {transform_indices = @transform_6, window_bounds = array<i64: 1, 8, 128>}]} {
    %c0 = arith.constant 0 : index
    %c0_0 = arith.constant 0 : index
    %c0_1 = arith.constant 0 : index
    %0 = vector.load %arg4[%c0, %c0_0, %c0_1] : memref<3x8x128xf32, #tpu.memory_space<vmem>>, vector<1x8x128xf32>
    %1 = vector.shape_cast %0 : vector<1x8x128xf32> to vector<8x128xf32>
    %c0_2 = arith.constant 0 : index
    %c0_3 = arith.constant 0 : index
    %c0_4 = arith.constant 0 : index
    %2 = vector.load %arg2[%c0_2, %c0_3, %c0_4] : memref<3x8x128xf32, #tpu.memory_space<vmem>>, vector<1x8x128xf32>
    %3 = vector.shape_cast %2 : vector<1x8x128xf32> to vector<8x128xf32>
    %4 = arith.addf %1, %3 : vector<8x128xf32>
    %c1 = arith.constant 1 : index
    %c0_5 = arith.constant 0 : index
    %c0_6 = arith.constant 0 : index
    %5 = vector.load %arg4[%c1, %c0_5, %c0_6] : memref<3x8x128xf32, #tpu.memory_space<vmem>>, vector<1x8x128xf32>
    %6 = vector.shape_cast %5 : vector<1x8x128xf32> to vector<8x128xf32>
    %c1_7 = arith.constant 1 : index
    %c0_8 = arith.constant 0 : index
    %c0_9 = arith.constant 0 : index
    %7 = vector.load %arg2[%c1_7, %c0_8, %c0_9] : memref<3x8x128xf32, #tpu.memory_space<vmem>>, vector<1x8x128xf32>
    %8 = vector.shape_cast %7 : vector<1x8x128xf32> to vector<8x128xf32>
    %9 = arith.addf %6, %8 : vector<8x128xf32>
    %c2 = arith.constant 2 : index
    %c0_10 = arith.constant 0 : index
    %c0_11 = arith.constant 0 : index
    %10 = vector.load %arg4[%c2, %c0_10, %c0_11] : memref<3x8x128xf32, #tpu.memory_space<vmem>>, vector<1x8x128xf32>
    %11 = vector.shape_cast %10 : vector<1x8x128xf32> to vector<8x128xf32>
    %c2_12 = arith.constant 2 : index
    %c0_13 = arith.constant 0 : index
    %c0_14 = arith.constant 0 : index
    %12 = vector.load %arg2[%c2_12, %c0_13, %c0_14] : memref<3x8x128xf32, #tpu.memory_space<vmem>>, vector<1x8x128xf32>
    %13 = vector.shape_cast %12 : vector<1x8x128xf32> to vector<8x128xf32>
    %14 = arith.addf %11, %13 : vector<8x128xf32>
    %15 = arith.mulf %4, %4 : vector<8x128xf32>
    %16 = arith.mulf %9, %9 : vector<8x128xf32>
    %17 = arith.addf %15, %16 : vector<8x128xf32>
    %18 = arith.mulf %14, %14 : vector<8x128xf32>
    %19 = arith.addf %17, %18 : vector<8x128xf32>
    %cst = arith.constant 1.000000e-24 : f32
    %20 = vector.broadcast %cst : f32 to vector<8x128xf32>
    %21 = arith.maximumf %19, %20 : vector<8x128xf32>
    %22 = math.rsqrt %21 : vector<8x128xf32>
    %c0_15 = arith.constant 0 : index
    %c0_16 = arith.constant 0 : index
    %c0_17 = arith.constant 0 : index
    %23 = vector.load %arg3[%c0_15, %c0_16, %c0_17] : memref<3x8x128xf32, #tpu.memory_space<vmem>>, vector<1x8x128xf32>
    %24 = vector.shape_cast %23 : vector<1x8x128xf32> to vector<8x128xf32>
    %25 = arith.mulf %4, %24 : vector<8x128xf32>
    %c1_18 = arith.constant 1 : index
    %c0_19 = arith.constant 0 : index
    %c0_20 = arith.constant 0 : index
    %26 = vector.load %arg3[%c1_18, %c0_19, %c0_20] : memref<3x8x128xf32, #tpu.memory_space<vmem>>, vector<1x8x128xf32>
    %27 = vector.shape_cast %26 : vector<1x8x128xf32> to vector<8x128xf32>
    %28 = arith.mulf %9, %27 : vector<8x128xf32>
    %29 = arith.addf %25, %28 : vector<8x128xf32>
    %c2_21 = arith.constant 2 : index
    %c0_22 = arith.constant 0 : index
    %c0_23 = arith.constant 0 : index
    %30 = vector.load %arg3[%c2_21, %c0_22, %c0_23] : memref<3x8x128xf32, #tpu.memory_space<vmem>>, vector<1x8x128xf32>
    %31 = vector.shape_cast %30 : vector<1x8x128xf32> to vector<8x128xf32>
    %32 = arith.mulf %14, %31 : vector<8x128xf32>
    %33 = arith.addf %29, %32 : vector<8x128xf32>
    %34 = arith.mulf %33, %22 : vector<8x128xf32>
    %cst_24 = arith.constant 1.000000e+00 : f32
    %35 = vector.broadcast %cst_24 : f32 to vector<8x128xf32>
    %36 = arith.subf %34, %35 : vector<8x128xf32>
    %c0_25 = arith.constant 0 : index
    %c0_26 = arith.constant 0 : index
    %c0_27 = arith.constant 0 : index
    %37 = vector.load %arg6[%c0_25, %c0_26, %c0_27] : memref<9x8x128xf32, #tpu.memory_space<vmem>>, vector<1x8x128xf32>
    %38 = vector.shape_cast %37 : vector<1x8x128xf32> to vector<8x128xf32>
    %c0_28 = arith.constant 0 : index
    %39 = memref.load %arg1[%c0_28] : memref<9xf32, #tpu.memory_space<smem>>
    %40 = vector.broadcast %39 : f32 to vector<8x128xf32>
    %41 = arith.mulf %40, %36 : vector<8x128xf32>
    %42 = math.exp %41 : vector<8x128xf32>
    %43 = arith.mulf %38, %42 : vector<8x128xf32>
    %c1_29 = arith.constant 1 : index
    %c0_30 = arith.constant 0 : index
    %c0_31 = arith.constant 0 : index
    %44 = vector.load %arg6[%c1_29, %c0_30, %c0_31] : memref<9x8x128xf32, #tpu.memory_space<vmem>>, vector<1x8x128xf32>
    %45 = vector.shape_cast %44 : vector<1x8x128xf32> to vector<8x128xf32>
    %c1_32 = arith.constant 1 : index
    %46 = memref.load %arg1[%c1_32] : memref<9xf32, #tpu.memory_space<smem>>
    %47 = vector.broadcast %46 : f32 to vector<8x128xf32>
    %48 = arith.mulf %47, %36 : vector<8x128xf32>
    %49 = math.exp %48 : vector<8x128xf32>
    %50 = arith.mulf %45, %49 : vector<8x128xf32>
    %51 = arith.addf %43, %50 : vector<8x128xf32>
    %c2_33 = arith.constant 2 : index
    %c0_34 = arith.constant 0 : index
    %c0_35 = arith.constant 0 : index
    %52 = vector.load %arg6[%c2_33, %c0_34, %c0_35] : memref<9x8x128xf32, #tpu.memory_space<vmem>>, vector<1x8x128xf32>
    %53 = vector.shape_cast %52 : vector<1x8x128xf32> to vector<8x128xf32>
    %c2_36 = arith.constant 2 : index
    %54 = memref.load %arg1[%c2_36] : memref<9xf32, #tpu.memory_space<smem>>
    %55 = vector.broadcast %54 : f32 to vector<8x128xf32>
    %56 = arith.mulf %55, %36 : vector<8x128xf32>
    %57 = math.exp %56 : vector<8x128xf32>
    %58 = arith.mulf %53, %57 : vector<8x128xf32>
    %59 = arith.addf %51, %58 : vector<8x128xf32>
    %c3 = arith.constant 3 : index
    %c0_37 = arith.constant 0 : index
    %c0_38 = arith.constant 0 : index
    %60 = vector.load %arg6[%c3, %c0_37, %c0_38] : memref<9x8x128xf32, #tpu.memory_space<vmem>>, vector<1x8x128xf32>
    %61 = vector.shape_cast %60 : vector<1x8x128xf32> to vector<8x128xf32>
    %c3_39 = arith.constant 3 : index
    %62 = memref.load %arg1[%c3_39] : memref<9xf32, #tpu.memory_space<smem>>
    %63 = vector.broadcast %62 : f32 to vector<8x128xf32>
    %64 = arith.mulf %63, %36 : vector<8x128xf32>
    %65 = math.exp %64 : vector<8x128xf32>
    %66 = arith.mulf %61, %65 : vector<8x128xf32>
    %67 = arith.addf %59, %66 : vector<8x128xf32>
    %c4 = arith.constant 4 : index
    %c0_40 = arith.constant 0 : index
    %c0_41 = arith.constant 0 : index
    %68 = vector.load %arg6[%c4, %c0_40, %c0_41] : memref<9x8x128xf32, #tpu.memory_space<vmem>>, vector<1x8x128xf32>
    %69 = vector.shape_cast %68 : vector<1x8x128xf32> to vector<8x128xf32>
    %c4_42 = arith.constant 4 : index
    %70 = memref.load %arg1[%c4_42] : memref<9xf32, #tpu.memory_space<smem>>
    %71 = vector.broadcast %70 : f32 to vector<8x128xf32>
    %72 = arith.mulf %71, %36 : vector<8x128xf32>
    %73 = math.exp %72 : vector<8x128xf32>
    %74 = arith.mulf %69, %73 : vector<8x128xf32>
    %75 = arith.addf %67, %74 : vector<8x128xf32>
    %c5 = arith.constant 5 : index
    %c0_43 = arith.constant 0 : index
    %c0_44 = arith.constant 0 : index
    %76 = vector.load %arg6[%c5, %c0_43, %c0_44] : memref<9x8x128xf32, #tpu.memory_space<vmem>>, vector<1x8x128xf32>
    %77 = vector.shape_cast %76 : vector<1x8x128xf32> to vector<8x128xf32>
    %c5_45 = arith.constant 5 : index
    %78 = memref.load %arg1[%c5_45] : memref<9xf32, #tpu.memory_space<smem>>
    %79 = vector.broadcast %78 : f32 to vector<8x128xf32>
    %80 = arith.mulf %79, %36 : vector<8x128xf32>
    %81 = math.exp %80 : vector<8x128xf32>
    %82 = arith.mulf %77, %81 : vector<8x128xf32>
    %83 = arith.addf %75, %82 : vector<8x128xf32>
    %c6 = arith.constant 6 : index
    %c0_46 = arith.constant 0 : index
    %c0_47 = arith.constant 0 : index
    %84 = vector.load %arg6[%c6, %c0_46, %c0_47] : memref<9x8x128xf32, #tpu.memory_space<vmem>>, vector<1x8x128xf32>
    %85 = vector.shape_cast %84 : vector<1x8x128xf32> to vector<8x128xf32>
    %c6_48 = arith.constant 6 : index
    %86 = memref.load %arg1[%c6_48] : memref<9xf32, #tpu.memory_space<smem>>
    %87 = vector.broadcast %86 : f32 to vector<8x128xf32>
    %88 = arith.mulf %87, %36 : vector<8x128xf32>
    %89 = math.exp %88 : vector<8x128xf32>
    %90 = arith.mulf %85, %89 : vector<8x128xf32>
    %91 = arith.addf %83, %90 : vector<8x128xf32>
    %c7 = arith.constant 7 : index
    %c0_49 = arith.constant 0 : index
    %c0_50 = arith.constant 0 : index
    %92 = vector.load %arg6[%c7, %c0_49, %c0_50] : memref<9x8x128xf32, #tpu.memory_space<vmem>>, vector<1x8x128xf32>
    %93 = vector.shape_cast %92 : vector<1x8x128xf32> to vector<8x128xf32>
    %c7_51 = arith.constant 7 : index
    %94 = memref.load %arg1[%c7_51] : memref<9xf32, #tpu.memory_space<smem>>
    %95 = vector.broadcast %94 : f32 to vector<8x128xf32>
    %96 = arith.mulf %95, %36 : vector<8x128xf32>
    %97 = math.exp %96 : vector<8x128xf32>
    %98 = arith.mulf %93, %97 : vector<8x128xf32>
    %99 = arith.addf %91, %98 : vector<8x128xf32>
    %c8 = arith.constant 8 : index
    %c0_52 = arith.constant 0 : index
    %c0_53 = arith.constant 0 : index
    %100 = vector.load %arg6[%c8, %c0_52, %c0_53] : memref<9x8x128xf32, #tpu.memory_space<vmem>>, vector<1x8x128xf32>
    %101 = vector.shape_cast %100 : vector<1x8x128xf32> to vector<8x128xf32>
    %c8_54 = arith.constant 8 : index
    %102 = memref.load %arg1[%c8_54] : memref<9xf32, #tpu.memory_space<smem>>
    %103 = vector.broadcast %102 : f32 to vector<8x128xf32>
    %104 = arith.mulf %103, %36 : vector<8x128xf32>
    %105 = math.exp %104 : vector<8x128xf32>
    %106 = arith.mulf %101, %105 : vector<8x128xf32>
    %107 = arith.addf %99, %106 : vector<8x128xf32>
    %cst_55 = arith.constant 0.000000e+00 : f32
    %108 = vector.broadcast %cst_55 : f32 to vector<8x128xf32>
    %109 = arith.maximumf %107, %108 : vector<8x128xf32>
    %c0_56 = arith.constant 0 : index
    %c0_57 = arith.constant 0 : index
    %c0_58 = arith.constant 0 : index
    %110 = vector.load %arg8[%c0_56, %c0_57, %c0_58] : memref<1x8x128xf32, #tpu.memory_space<vmem>>, vector<1x8x128xf32>
    %111 = vector.shape_cast %110 : vector<1x8x128xf32> to vector<8x128xf32>
    %112 = vector.shape_cast %109 : vector<8x128xf32> to vector<1x8x128xf32>
    tpu.vector_store %arg8[%c0_56, %c0_57, %c0_58], %112 {strides = array<i32>} : memref<1x8x128xf32, #tpu.memory_space<vmem>>, vector<1x8x128xf32>,
    %c0_59 = arith.constant 0 : index
    %c0_60 = arith.constant 0 : index
    %c0_61 = arith.constant 0 : index
    %113 = vector.load %arg5[%c0_59, %c0_60, %c0_61] : memref<3x8x128xf32, #tpu.memory_space<vmem>>, vector<1x8x128xf32>
    %114 = vector.shape_cast %113 : vector<1x8x128xf32> to vector<8x128xf32>
    %115 = arith.addf %114, %109 : vector<8x128xf32>
    %c0_62 = arith.constant 0 : index
    %c0_63 = arith.constant 0 : index
    %c0_64 = arith.constant 0 : index
    %116 = vector.load %arg7[%c0_62, %c0_63, %c0_64] : memref<3x8x128xf32, #tpu.memory_space<vmem>>, vector<1x8x128xf32>
    %117 = vector.shape_cast %116 : vector<1x8x128xf32> to vector<8x128xf32>
    %118 = vector.shape_cast %115 : vector<8x128xf32> to vector<1x8x128xf32>
    tpu.vector_store %arg7[%c0_62, %c0_63, %c0_64], %118 {strides = array<i32>} : memref<3x8x128xf32, #tpu.memory_space<vmem>>, vector<1x8x128xf32>,
    %c1_65 = arith.constant 1 : index
    %c0_66 = arith.constant 0 : index
    %c0_67 = arith.constant 0 : index
    %119 = vector.load %arg5[%c1_65, %c0_66, %c0_67] : memref<3x8x128xf32, #tpu.memory_space<vmem>>, vector<1x8x128xf32>
    %120 = vector.shape_cast %119 : vector<1x8x128xf32> to vector<8x128xf32>
    %121 = arith.addf %120, %109 : vector<8x128xf32>
    %c1_68 = arith.constant 1 : index
    %c0_69 = arith.constant 0 : index
    %c0_70 = arith.constant 0 : index
    %122 = vector.load %arg7[%c1_68, %c0_69, %c0_70] : memref<3x8x128xf32, #tpu.memory_space<vmem>>, vector<1x8x128xf32>
    %123 = vector.shape_cast %122 : vector<1x8x128xf32> to vector<8x128xf32>
    %124 = vector.shape_cast %121 : vector<8x128xf32> to vector<1x8x128xf32>
    tpu.vector_store %arg7[%c1_68, %c0_69, %c0_70], %124 {strides = array<i32>} : memref<3x8x128xf32, #tpu.memory_space<vmem>>, vector<1x8x128xf32>,
    %c2_71 = arith.constant 2 : index
    %c0_72 = arith.constant 0 : index
    %c0_73 = arith.constant 0 : index
    %125 = vector.load %arg5[%c2_71, %c0_72, %c0_73] : memref<3x8x128xf32, #tpu.memory_space<vmem>>, vector<1x8x128xf32>
    %126 = vector.shape_cast %125 : vector<1x8x128xf32> to vector<8x128xf32>
    %127 = arith.addf %126, %109 : vector<8x128xf32>
    %c2_74 = arith.constant 2 : index
    %c0_75 = arith.constant 0 : index
    %c0_76 = arith.constant 0 : index
    %128 = vector.load %arg7[%c2_74, %c0_75, %c0_76] : memref<3x8x128xf32, #tpu.memory_space<vmem>>, vector<1x8x128xf32>
    %129 = vector.shape_cast %128 : vector<1x8x128xf32> to vector<8x128xf32>
    %130 = vector.shape_cast %127 : vector<8x128xf32> to vector<1x8x128xf32>
    tpu.vector_store %arg7[%c2_74, %c0_75, %c0_76], %130 {strides = array<i32>} : memref<3x8x128xf32, #tpu.memory_space<vmem>>, vector<1x8x128xf32>,
    return
  }
  func.func @transform_0(%arg0: i32, %arg1: memref<9xf32, #tpu.memory_space<smem>>) -> (i32, i32, i32) {
    %c0_i32 = arith.constant 0 : i32
    %c0_i32_0 = arith.constant 0 : i32
    %c0_i32_1 = arith.constant 0 : i32
    return %c0_i32, %arg0, %c0_i32_0 : i32, i32, i32
  }
  func.func @transform_1(%arg0: i32, %arg1: memref<9xf32, #tpu.memory_space<smem>>) -> (i32, i32, i32) {
    %c0_i32 = arith.constant 0 : i32
    %c0_i32_0 = arith.constant 0 : i32
    %c0_i32_1 = arith.constant 0 : i32
    return %c0_i32, %arg0, %c0_i32_0 : i32, i32, i32
  }
  func.func @transform_2(%arg0: i32, %arg1: memref<9xf32, #tpu.memory_space<smem>>) -> (i32, i32, i32) {
    %c0_i32 = arith.constant 0 : i32
    %c0_i32_0 = arith.constant 0 : i32
    %c0_i32_1 = arith.constant 0 : i32
    return %c0_i32, %arg0, %c0_i32_0 : i32, i32, i32
  }
  func.func @transform_3(%arg0: i32, %arg1: memref<9xf32, #tpu.memory_space<smem>>) -> (i32, i32, i32) {
    %c0_i32 = arith.constant 0 : i32
    %c0_i32_0 = arith.constant 0 : i32
    %c0_i32_1 = arith.constant 0 : i32
    return %c0_i32, %arg0, %c0_i32_0 : i32, i32, i32
  }
  func.func @transform_4(%arg0: i32, %arg1: memref<9xf32, #tpu.memory_space<smem>>) -> (i32, i32, i32) {
    %c0_i32 = arith.constant 0 : i32
    %c0_i32_0 = arith.constant 0 : i32
    %c0_i32_1 = arith.constant 0 : i32
    return %c0_i32, %arg0, %c0_i32_0 : i32, i32, i32
  }
  func.func @transform_5(%arg0: i32, %arg1: memref<9xf32, #tpu.memory_space<smem>>) -> (i32, i32, i32) {
    %c0_i32 = arith.constant 0 : i32
    %c0_i32_0 = arith.constant 0 : i32
    %c0_i32_1 = arith.constant 0 : i32
    return %c0_i32, %arg0, %c0_i32_0 : i32, i32, i32
  }
  func.func @transform_6(%arg0: i32, %arg1: memref<9xf32, #tpu.memory_space<smem>>) -> (i32, i32, i32) {
    %c0_i32 = arith.constant 0 : i32
    %c0_i32_0 = arith.constant 0 : i32
    %c0_i32_1 = arith.constant 0 : i32
    return %c0_i32, %arg0, %c0_i32_0 : i32, i32, i32
  }
}

</mosaic_0001>

<bundles_post_ra>
// kernel: tpu_custom_call.1
= control target key start
LH: loop header
LB: loop body
LE: loop exit
PB: predicated region body
PF: predicated region fallthrough
CT: control target
= control target key end

     0   :  { %s455_s24 = smov [#allocation3]   ;;  %s547_s0 = inlined_call_operand.hbm [shape: f32[9], index: 0, kind: input, shape index: {}]   ;;  %s548_s1 = inlined_call_operand.hbm [shape: f32[3,8,128], index: 1, kind: input, shape index: {}]   ;;  %s549_s2 = inlined_call_operand.hbm [shape: f32[3,8,128], index: 2, kind: input, shape index: {}]   ;;  %s550_s3 = inlined_call_operand.hbm [shape: f32[3,8,128], index: 3, kind: input, shape index: {}]   ;;  %s551_s4 = inlined_call_operand.hbm [shape: f32[3,8,128], index: 4, kind: input, shape index: {}]   ;;  %s552_s5 = inlined_call_operand.hbm [shape: f32[9,8,128], index: 5, kind: input, shape index: {}]   ;;  %s553_s6 = inlined_call_operand.hbm [shape: f32[3,8,128], index: 6, kind: output, shape index: {0}]   ;;  %s554_s7 = inlined_call_operand.hbm [shape: f32[1,8,128], index: 7, kind: output, shape index: {1}]  }
   0x1   :  { %14 = dma.hbm_to_smem %s547_s0, 16, %s455_s24, [#allocation2] }
   0x2   :  { %443 = dma.done.wait [#allocation2], 16 }
   0x3   :  { %444 = vsyncadd [#allocation2], 4294967280 }
   0x4   :  { %16 = sfence }
   0x5   :  { %17 = vsyncpa [#allocation5], 0 }
   0x6   :  { %18 = vsyncpa [#allocation8], 0 }
   0x7   :  { %19 = vsyncpa [#allocation11], 0 }
   0x8   :  { %20 = vsyncpa [#allocation6], 0 }
   0x9   :  { %21 = vsyncpa [#allocation15], 0  ;;  %s456_s27 = smov [#allocation7]   ;;  %s457_s29 = smov [#allocation10]  }
   0xa   :  { %s39_s28 = sshll.u32 %s456_s27, 4  ;;  %s63_s30 = sshll.u32 %s457_s29, 4  ;;  %s40_s28 = int_to_ptr.vmem [resolvable:$true] %s39_s28  ;;  %s64_s30 = int_to_ptr.vmem [resolvable:$true] %s63_s30 }
   0xb   :  { %s311_s8 = scalar_lea.vmem %s40_s28, 384  ;;  %p316_p1 = scmp.lt.s32.totalorder %s40_s28, %s40_s28 }
   0xc   :  { %p312_p0 = scmp.ne.s32.totalorder %s40_s28, %s311_s8  ;;  %p317_p2 = scmp.lt.s32.totalorder %s311_s8, %s311_s8 }
   0xe   :  { %p318_p3 = por %p317_p2, %p316_p1 }
  0x10   :  { %p319_p4 = pnand %p318_p3, %p312_p0 }
  0x12   :  { %322 = shalt.err (!%p319_p4)
}
  0x13   :  { %s458_s0 = smov 128   ;;  %s459_s9 = smov 8  }
  0x14   :  { %45 = dma.hbm_to_vmem [thread:$0]  %s549_s2, 384, %s40_s28, [#allocation8], %s458_s0, %s458_s0, %s459_s9  }
  0x15   :  { %s331_s12 = scalar_lea.vmem %s64_s30, 384  ;;  %p336_p6 = scmp.lt.s32.totalorder %s64_s30, %s64_s30 }
  0x16   :  { %p332_p5 = scmp.ne.s32.totalorder %s64_s30, %s331_s12  ;;  %p337_p7 = scmp.lt.s32.totalorder %s331_s12, %s331_s12 }
  0x18   :  { %p338_p8 = por %p337_p7, %p336_p6 }
  0x1a   :  { %p339_p9 = pnand %p338_p8, %p332_p5 }
  0x1c   :  { %342 = shalt.err (!%p339_p9)
}
  0x1d   :  { %69 = dma.hbm_to_vmem [thread:$0]  %s551_s4, 384, %s64_s30, [#allocation11], %s458_s0, %s458_s0, %s459_s9  }
  0x1e   :  { %s460_s15 = smov [#allocation4]   ;;  %s461_s17 = smov [#allocation9]  }
  0x1f   :  { %s27_s16 = sshll.u32 %s460_s15, 4  ;;  %s51_s18 = sshll.u32 %s461_s17, 4  ;;  %s28_s16 = int_to_ptr.vmem [resolvable:$true] %s27_s16  ;;  %s52_s18 = int_to_ptr.vmem [resolvable:$true] %s51_s18 }
  0x20   :  { %s351_s2 = scalar_lea.vmem %s28_s16, 384  ;;  %p356_p11 = scmp.lt.s32.totalorder %s28_s16, %s28_s16 }
  0x21   :  { %p352_p10 = scmp.ne.s32.totalorder %s28_s16, %s351_s2  ;;  %p357_p12 = scmp.lt.s32.totalorder %s351_s2, %s351_s2 }
  0x23   :  { %p358_p13 = por %p357_p12, %p356_p11 }
  0x25   :  { %p359_p0 = pnand %p358_p13, %p352_p10 }
  0x27   :  { %362 = shalt.err (!%p359_p0)
}
  0x28   :  { %33 = dma.hbm_to_vmem [thread:$0]  %s548_s1, 384, %s28_s16, [#allocation5], %s458_s0, %s458_s0, %s459_s9  }
  0x29   :  { %s371_s4 = scalar_lea.vmem %s52_s18, 384  ;;  %p376_p2 = scmp.lt.s32.totalorder %s52_s18, %s52_s18 }
  0x2a   :  { %p372_p1 = scmp.ne.s32.totalorder %s52_s18, %s371_s4  ;;  %p377_p3 = scmp.lt.s32.totalorder %s371_s4, %s371_s4 }
  0x2c   :  { %p378_p4 = por %p377_p3, %p376_p2 }
  0x2e   :  { %p379_p5 = pnand %p378_p4, %p372_p1 }
  0x30   :  { %382 = shalt.err (!%p379_p5)
}
  0x31   :  { %57 = dma.hbm_to_vmem [thread:$0]  %s550_s3, 384, %s52_s18, [#allocation8], %s458_s0, %s458_s0, %s459_s9  }
  0x32   :  { %s462_s23 = smov [#allocation12]  }
  0x33   :  { %s75_s24 = sshll.u32 %s462_s23, 4  ;;  %s76_s24 = int_to_ptr.vmem [resolvable:$true] %s75_s24 }
  0x34   :  { %s391_s25 = scalar_lea.vmem %s76_s24, 1152  ;;  %p396_p7 = scmp.lt.s32.totalorder %s76_s24, %s76_s24 }
  0x35   :  { %p392_p6 = scmp.ne.s32.totalorder %s76_s24, %s391_s25  ;;  %p397_p8 = scmp.lt.s32.totalorder %s391_s25, %s391_s25 }
  0x37   :  { %p398_p9 = por %p397_p8, %p396_p7 }
  0x39   :  { %p399_p10 = pnand %p398_p9, %p392_p6 }
  0x3b   :  { %402 = shalt.err (!%p399_p10)
}
  0x3c   :  { %81 = dma.hbm_to_vmem [thread:$0]  %s552_s5, 1152, %s76_s24, [#allocation11], %s458_s0, %s458_s0, %s459_s9  }
  0x3d   :  { %445 = dma.done.wait [#allocation5], 384  }
  0x3e   :  { %446 = vsyncadd [#allocation5], 4294966912 }
  0x3f   :  { %447 = dma.done.wait [#allocation8], 768  }
  0x40   :  { %448 = vsyncadd [#allocation8], 4294966528 }
  0x41   :  { %449 = dma.done.wait [#allocation11], 1536  }
  0x42   :  { %450 = vsyncadd [#allocation11], 4294965760  ;;  %v97_v0 = vld [vmem:[#allocation9] sm:$0xff]  ;;  %v98_v1 = vld [vmem:[#allocation4] sm:$0xff]  ;;  %s130_s3 = sld [smem:[#allocation3]]  ;;  %s463_s12 = smov [#allocation14]  }
  0x43   :  { %v101_v2 = vld [vmem:[#allocation9 + $0x8] sm:$0xff]  ;;  %v99_v3 = vadd.f32 %v98_v1, %v97_v0  ;;  %v103_v4 = vld [vmem:[#allocation4 + $0x8] sm:$0xff]  ;;  %v106_v5 = vld [vmem:[#allocation9 + $0x10] sm:$0xff]  ;;  %s257_s5 = sld [smem:[#allocation3 + $0x1]]  ;;  %s241_s13 = sshll.u32 %s463_s12, 4  ;;  %s242_s13 = int_to_ptr.vmem [resolvable:$true] %s241_s13 }
  0x44   :  { %v108_v6 = vld [vmem:[#allocation4 + $0x10] sm:$0xff]  ;;  %v104_v7 = vadd.f32 %v103_v4, %v101_v2  ;;  %v117_v15 = vld [vmem:[#allocation7] sm:$0xff]  ;;  %v120_v16 = vld [vmem:[#allocation7 + $0x8] sm:$0xff]  ;;  %s258_s27 = sld [smem:[#allocation3 + $0x2]]  ;;  %s464_s14 = smov [#allocation13]  }
  0x45   :  { %v109_v8 = vadd.f32 %v108_v6, %v106_v5  ;;  %v110_v9 = vmul.f32 %v99_v3, %v99_v3  ;;  %v118_v17 = vmul.f32 %v117_v15, %v99_v3  ;;  %v124_v19 = vld [vmem:[#allocation7 + $0x10] sm:$0xff]  ;;  %s259_s28 = sld [smem:[#allocation3 + $0x3]]  ;;  %v129_v53 = vld [vmem:[#allocation12] sm:$0xff]  ;;  %v146_v56 = vld [vmem:[#allocation12 + $0x10] sm:$0xff]  ;;  %s228_s15 = sshll.u32 %s464_s14, 4  ;;  %s229_s15 = int_to_ptr.vmem [resolvable:$true] %s228_s15 }
  0x46   :  { %v111_v10 = vmul.f32 %v104_v7, %v104_v7  ;;  %v121_v18 = vmul.f32 %v120_v16, %v104_v7  ;;  %s260_s29 = sld [smem:[#allocation3 + $0x4]]  ;;  %v137_v54 = vld [vmem:[#allocation12 + $0x8] sm:$0xff]  ;;  %v155_v59 = vld [vmem:[#allocation12 + $0x18] sm:$0xff]  ;;  %v164_v0 = vld [vmem:[#allocation12 + $0x20] sm:$0xff]  ;;  %s403_s16 = scalar_lea.vmem %s242_s13, 128 }
  0x47   :  { %v113_v11 = vmul.f32 %v109_v8, %v109_v8  ;;  %v125_v21 = vmul.f32 %v124_v19, %v109_v8  ;;  %s261_s30 = sld [smem:[#allocation3 + $0x5]]  ;;  %v173_v5 = vld [vmem:[#allocation12 + $0x28] sm:$0xff]  ;;  %p404_p11 = scmp.ne.s32.totalorder %s242_s13, %s403_s16 }
  0x48   :  { %v112_v12 = vadd.f32 %v111_v10, %v110_v9  ;;  %v122_v20 = vadd.f32 %v121_v18, %v118_v17  ;;  %s262_s8 = sld [smem:[#allocation3 + $0x6]]  ;;  %v131_v25 = vstv %s130_s3  ;;  %v182_v9 = vld [vmem:[#allocation12 + $0x30] sm:$0xff]  ;;  %v200_v17 = vld [vmem:[#allocation12 + $0x40] sm:$0xff]  ;;  %p408_p12 = scmp.lt.s32.totalorder %s242_s13, %s242_s13 }
  0x49   :  { %s263_s10 = sld [smem:[#allocation3 + $0x7]]  ;;  %v139_v26 = vstv %s257_s5  ;;  %p409_p13 = scmp.lt.s32.totalorder %s403_s16, %s403_s16 }
  0x4a   :  { %v114_v13 = vadd.f32 %v113_v11, %v112_v12  ;;  %v126_v22 = vadd.f32 %v125_v21, %v122_v20  ;;  %s264_s11 = sld [smem:[#allocation3 + $0x8]]  ;;  %v148_v27 = vstv %s258_s27 }
  0x4b   :  { %v157_v28 = vstv %s259_s28  ;;  %p410_p0 = por %p409_p13, %p408_p12 }
  0x4c   :  { %v115_v14 = vmax.f32 %v114_v13, 1e-24  ;;  %v166_v30 = vstv %s260_s29  ;;  %v191_v13 = vld [vmem:[#allocation12 + $0x38] sm:$0xff] }
  0x4d   :  { %v175_v31 = vstv %s261_s30  ;;  %p411_p1 = pnand %p410_p0, %p404_p11 }
  0x4e   :  { %275 = vrsqrt.f32 %v115_v14  ;;  %v184_v32 = vstv %s262_s8 }
  0x4f   :  { %v193_v42 = vstv %s263_s10 }
  0x50   :  { %v202_v46 = vstv %s264_s11 }
  0x5b   :  { %v276_v23 = vpop.eup %275 }
  0x5c   :  { %v127_v24 = vmul.f32 %v276_v23, %v126_v22 }
  0x5e   :  { %v256_v29 = vadd.f32 -1.0, %v127_v24  ;;  %v210_v24 = vld [vmem:[#allocation10] sm:$0xff] }
  0x60   :  { %v132_v33 = vmul.f32 %v256_v29, %v131_v25  ;;  %v140_v34 = vmul.f32 %v256_v29, %v139_v26  ;;  %v149_v35 = vmul.f32 %v256_v29, %v148_v27  ;;  %v158_v36 = vmul.f32 %v256_v29, %v157_v28  ;;  %v214_v25 = vld [vmem:[#allocation10 + $0x8] sm:$0xff]  ;;  %v219_v26 = vld [vmem:[#allocation10 + $0x10] sm:$0xff] }
  0x61   :  { %v167_v37 = vmul.f32 %v256_v29, %v166_v30  ;;  %v176_v38 = vmul.f32 %v256_v29, %v175_v31  ;;  %v185_v44 = vmul.f32 %v256_v29, %v184_v32  ;;  %v194_v48 = vmul.f32 %v256_v29, %v193_v42 }
  0x62   :  { %v133_v39 = vmul.f32 1.442695, %v132_v33  ;;  %v141_v40 = vmul.f32 1.442695, %v140_v34  ;;  %v150_v41 = vmul.f32 1.442695, %v149_v35  ;;  %v203_v50 = vmul.f32 %v256_v29, %v202_v46 }
  0x63   :  { %v159_v43 = vmul.f32 1.442695, %v158_v36  ;;  %v168_v45 = vmul.f32 1.442695, %v167_v37  ;;  %v177_v47 = vmul.f32 1.442695, %v176_v38 }
  0x64   :  { %277 = vpow2.f32 %v133_v39  ;;  %v186_v49 = vmul.f32 1.442695, %v185_v44  ;;  %v195_v51 = vmul.f32 1.442695, %v194_v48  ;;  %v204_v52 = vmul.f32 1.442695, %v203_v50 }
  0x65   :  { %279 = vpow2.f32 %v141_v40 }
  0x66   :  { %281 = vpow2.f32 %v150_v41 }
  0x67   :  { %283 = vpow2.f32 %v159_v43 }
  0x68   :  { %285 = vpow2.f32 %v168_v45 }
  0x69   :  { %287 = vpow2.f32 %v177_v47 }
  0x6a   :  { %289 = vpow2.f32 %v186_v49 }
  0x6b   :  { %291 = vpow2.f32 %v195_v51 }
  0x6c   :  { %293 = vpow2.f32 %v204_v52 }
  0x71   :  { %v278_v55 = vpop.eup %277 }
  0x72   :  { %v280_v57 = vpop.eup %279  ;;  %v135_v58 = vmul.f32 %v278_v55, %v129_v53 }
  0x73   :  { %v282_v60 = vpop.eup %281  ;;  %v143_v61 = vmul.f32 %v280_v57, %v137_v54 }
  0x74   :  { %v284_v62 = vpop.eup %283  ;;  %v152_v63 = vmul.f32 %v282_v60, %v146_v56 }
  0x75   :  { %v286_v1 = vpop.eup %285  ;;  %v144_v2 = vadd.f32 %v143_v61, %v135_v58  ;;  %v161_v3 = vmul.f32 %v284_v62, %v155_v59 }
  0x76   :  { %v288_v4 = vpop.eup %287  ;;  %v170_v7 = vmul.f32 %v286_v1, %v164_v0 }
  0x77   :  { %v153_v6 = vadd.f32 %v152_v63, %v144_v2  ;;  %v290_v8 = vpop.eup %289  ;;  %v179_v11 = vmul.f32 %v288_v4, %v173_v5 }
  0x78   :  { %v292_v12 = vpop.eup %291  ;;  %v188_v15 = vmul.f32 %v290_v8, %v182_v9 }
  0x79   :  { %v162_v10 = vadd.f32 %v161_v3, %v153_v6  ;;  %v294_v16 = vpop.eup %293  ;;  %v197_v19 = vmul.f32 %v292_v12, %v191_v13 }
  0x7a   :  { %v206_v21 = vmul.f32 %v294_v16, %v200_v17 }
  0x7b   :  { %v171_v14 = vadd.f32 %v170_v7, %v162_v10 }
  0x7d   :  { %v180_v18 = vadd.f32 %v179_v11, %v171_v14 }
  0x7f   :  { %v189_v20 = vadd.f32 %v188_v15, %v180_v18 }
  0x81   :  { %v198_v22 = vadd.f32 %v197_v19, %v189_v20 }
  0x83   :  { %v207_v23 = vadd.f32 %v206_v21, %v198_v22 }
  0x85   :  { %v208_v27 = vmax.f32 %v207_v23, 0.0 }
  0x87   :  { %209 = vst [vmem:[#allocation14] sm:$0xff] %v208_v27  ;;  %v211_v28 = vadd.f32 %v210_v24, %v208_v27  ;;  %v215_v29 = vadd.f32 %v214_v25, %v208_v27  ;;  %v220_v30 = vadd.f32 %v219_v26, %v208_v27 }
  0x88   :  { %414 = shalt.err (!%p411_p1)
}
  0x89   :  { %244 = dma.vmem_to_hbm [thread:$0]  %s242_s13, 128, %s554_s7, [#allocation15]   ;;  %212 = vst [vmem:[#allocation13] sm:$0xff] %v211_v28  ;;  %217 = vst [vmem:[#allocation13 + $0x8] sm:$0xff] %v215_v29 }
  0x8a   :  { %222 = vst [vmem:[#allocation13 + $0x10] sm:$0xff] %v220_v30  ;;  %s423_s2 = scalar_lea.vmem %s229_s15, 384  ;;  %p428_p3 = scmp.lt.s32.totalorder %s229_s15, %s229_s15 }
  0x8b   :  { %p424_p2 = scmp.ne.s32.totalorder %s229_s15, %s423_s2  ;;  %p429_p4 = scmp.lt.s32.totalorder %s423_s2, %s423_s2 }
  0x8d   :  { %p430_p5 = por %p429_p4, %p428_p3 }
  0x8f   :  { %p431_p6 = pnand %p430_p5, %p424_p2 }
  0x91   :  { %434 = shalt.err (!%p431_p6)
}
  0x92   :  { %234 = dma.vmem_to_hbm [thread:$0]  %s229_s15, 384, %s553_s6, [#allocation6], %s458_s0, %s458_s0, %s459_s9  }
  0x93   :  { %451 = dma.done.wait [#allocation6], 384  }
  0x94   :  { %452 = vsyncadd [#allocation6], 4294966912 }
  0x95   :  { %453 = dma.done.wait [#allocation15], 128  }
  0x96   :  { %454 = vsyncadd [#allocation15], 4294967168 }
  0x97   :  { %251 = vsyncpa [#allocation5], 1 }
  0x98   :  { %252 = vsyncpa [#allocation8], 1 }
  0x99   :  { %253 = vsyncpa [#allocation11], 1 }
  0x9a   :  { %254 = vsyncpa [#allocation6], 1 }
  0x9b   :  { %255 = vsyncpa [#allocation15], 1 }

</bundles_post_ra>
